<compile_context>
chip_gen: v6e
topology: v6e:2x2x1
jax: 0.10.0
libtpu: 0.0.40
codegen_flags: <defaults>
</compile_context>

<pallas_src>
import jax
import jax.numpy as jnp
from jax import lax
from jax.experimental import pallas as pl
from jax.experimental.pallas import tpu as pltpu

K_HOPS = 3       # cfg.gnn.layers_mp
LANE = 128
SUBLANE = 8


def _round_up(x, m):
    return ((x + m - 1) // m) * m


def _pad2d(x, rows, cols):
    r, c = x.shape
    if r == rows and c == cols:
        return x
    return jnp.pad(x, ((0, rows - r), (0, cols - c)))


# ---------------------------------------------------------------------------
# Tiled MXU matmul kernel: C[M, Nd] = A[M, Kd] @ B[Kd, Nd]
# grid = (row tiles, contraction tiles); f32 accumulator in VMEM.
# ---------------------------------------------------------------------------
def _matmul_kernel(a_ref, b_ref, o_ref, acc_ref):
    @pl.when(pl.program_id(1) == 0)
    def _init():
        acc_ref[...] = jnp.zeros_like(acc_ref)

    acc_ref[...] += jnp.dot(a_ref[...], b_ref[...],
                            preferred_element_type=jnp.float32)

    @pl.when(pl.program_id(1) == pl.num_programs(1) - 1)
    def _finalize():
        o_ref[...] = acc_ref[...].astype(o_ref.dtype)


def mxu_matmul(a, b, *, out_dtype, tm=128, tk=128):
    """Tiled C = A @ B.

    a: [M, Kd]  with M % tm == 0 and (Kd % tk == 0 or Kd <= tk with Kd % 8 == 0)
    b: [Kd, Nd] with Nd % 128 == 0 (Nd kept whole per row tile -> lane-dense stores)
    """
    M, Kd = a.shape
    Kd2, Nd = b.shape
    assert Kd == Kd2
    assert M % tm == 0 and Nd % LANE == 0
    if Kd % tk == 0:
        tk_eff = tk
    else:
        assert Kd <= tk and Kd % SUBLANE == 0, (Kd, tk)
        tk_eff = Kd
    grid = (M // tm, Kd // tk_eff)

    cost = pl.CostEstimate(
        flops=2 * M * Kd * Nd,
        transcendentals=0,
        bytes_accessed=(a.size * a.dtype.itemsize
                        + b.size * b.dtype.itemsize
                        + M * Nd * jnp.dtype(out_dtype).itemsize))

    return pl.pallas_call(
        _matmul_kernel,
        out_shape=jax.ShapeDtypeStruct((M, Nd), out_dtype),
        grid=grid,
        in_specs=[
            pl.BlockSpec((tm, tk_eff), lambda i, k: (i, k)),
            pl.BlockSpec((tk_eff, Nd), lambda i, k: (k, 0)),
        ],
        out_specs=pl.BlockSpec((tm, Nd), lambda i, k: (i, 0)),
        scratch_shapes=[pltpu.VMEM((tm, Nd), jnp.float32)],
        compiler_params=pltpu.CompilerParams(
            dimension_semantics=("parallel", "arbitrary")),
        cost_estimate=cost,
    )(a, b)


# ---------------------------------------------------------------------------
# SGC forward: (S^K) X W with bf16 MXU operands, f32 accumulation.
# ---------------------------------------------------------------------------
def sgc_forward(s, x, w, *, k_hops=K_HOPS, tm=128, tk=128,
                compute_dtype=jnp.bfloat16):
    """s: [N, N] normalized adjacency, x: [N, din], w: [din, dout] -> [N, dout] f32."""
    n, din = x.shape
    dout = w.shape[1]
    n_pad = _round_up(n, max(tm, tk))
    din_pad = _round_up(din, SUBLANE)
    dout_pad = _round_up(dout, LANE)   # lane-dense output / full MXU columns

    x_p = _pad2d(x, n_pad, din_pad).astype(compute_dtype)
    w_p = _pad2d(w, din_pad, dout_pad).astype(compute_dtype)
    s_p = _pad2d(s, n_pad, n_pad).astype(compute_dtype)

    # Feature transform: H = X @ W  (bias=False)
    h = mxu_matmul(x_p, w_p, tm=tm, tk=tk,
                   out_dtype=compute_dtype if k_hops > 0 else jnp.float32)

    # K propagation hops: H <- S @ H, one tiled pallas_call per hop.
    # XLA ping-pongs H between two buffers; in-place aliasing would be a RAW
    # hazard since each output row tile reads every row tile of the previous H.
    for hop in range(k_hops):
        last = hop == k_hops - 1
        h = mxu_matmul(s_p, h, tm=tm, tk=tk,
                       out_dtype=jnp.float32 if last else compute_dtype)

    # F.dropout(training=False) is the identity; slice off the padding.
    return h[:n, :dout]


# ---------------------------------------------------------------------------
# Plain-JAX glue: dense gcn_norm  D^-1/2 (A + I) D^-1/2
# ---------------------------------------------------------------------------
def gcn_norm_dense(edge_index, num_nodes):
    # TODO(synk): duplicate edges accumulate and self-loops stack on existing ones;
    #             this can differ slightly from PyG's add_remaining_self_loops path.
    row, col = edge_index[0], edge_index[1]
    a = jnp.zeros((num_nodes, num_nodes), jnp.float32)
    a = a.at[row, col].add(1.0)
    a_hat = a + jnp.eye(num_nodes, dtype=jnp.float32)
    deg = a_hat.sum(axis=1)
    deg_inv_sqrt = jnp.where(deg > 0, lax.rsqrt(deg), 0.0)
    return deg_inv_sqrt[:, None] * a_hat * deg_inv_sqrt[None, :]


if __name__ == "__main__":
    key = jax.random.PRNGKey(0)
    k_edges, k_x, k_w, k_y, k_mask = jax.random.split(key, 5)

    N = 200        # number of nodes (padded to 256 inside sgc_forward)
    DIM_IN = 32    # input feature dim
    DIM_OUT = 16   # output dim (node-level task -> conv maps dim_in -> dim_out)
    E = 800        # number of directed edges

    # Random graph, node features, labels, split mask.
    edge_index = jax.random.randint(k_edges, (2, E), 0, N, dtype=jnp.int32)
    x = jax.random.normal(k_x, (N, DIM_IN), dtype=jnp.float32)
    y = jax.random.randint(k_y, (N,), 0, DIM_OUT, dtype=jnp.int32)
    split_mask = jax.random.bernoulli(k_mask, 0.5, (N,))

    # Glorot-uniform init for SGConv's Linear(dim_in, dim_out, bias=False).
    limit = (6.0 / (DIM_IN + DIM_OUT)) ** 0.5
    w = jax.random.uniform(k_w, (DIM_IN, DIM_OUT), jnp.float32, -limit, limit)

    # Glue: normalized adjacency (gcn_norm) built outside the kernel.
    s = gcn_norm_dense(edge_index, N)

    # Hot path in Pallas: (S^K) X W
    out = sgc_forward(s, x, w)
    out = jax.block_until_ready(out)

    # _apply_index: pred = x[mask], label = y[mask]  (plain-JAX glue, eval path)
    pred = out[split_mask]
    label = y[split_mask]
    jax.block_until_ready(pred)
    jax.block_until_ready(label)

    # Reference matching the kernel's numerics: bf16 operands, f32 accumulation,
    # bf16 re-quantization of H between hops, f32 final hop.
    bf16, f32 = jnp.bfloat16, jnp.float32
    s_r = s.astype(bf16).astype(f32)
    hp = jnp.dot(x.astype(bf16).astype(f32), w.astype(bf16).astype(f32),
                 precision=lax.Precision.HIGHEST)
    for _ in range(K_HOPS):
        h_in = hp.astype(bf16).astype(f32)
        hp = jnp.dot(s_r, h_in, precision=lax.Precision.HIGHEST)
    ref = hp

    assert out.shape == (N, DIM_OUT)
    assert jnp.allclose(out, ref, atol=2e-3, rtol=2e-3), "mismatch vs reference"

    print("KERNEL_OK")
</pallas_src>

<mosaic_0001>
module attributes {stable_mosaic.version = 11 : i64} {
  func.func @_matmul_kernel(%arg0: i32, %arg1: i32, %arg2: memref<128x32xbf16, #tpu.memory_space<vmem>>, %arg3: memref<32x128xbf16, #tpu.memory_space<vmem>>, %arg4: memref<128x128xbf16, #tpu.memory_space<vmem>>, %arg5: memref<128x128xf32, #tpu.memory_space<vmem>>) attributes {dimension_semantics = [#tpu.dimension_semantics<parallel>, #tpu.dimension_semantics<arbitrary>], iteration_bounds = array<i64: 2, 1>, scalar_prefetch = 0 : i64, scratch_operands = 1 : i64, tpu.core_type = #tpu.core_type<tc>, window_params = [{transform_indices = @transform_0, window_bounds = array<i64: 128, 32>}, {transform_indices = @transform_1, window_bounds = array<i64: 32, 128>}, {transform_indices = @transform_2, window_bounds = array<i64: 128, 128>}]} {
    %c0_i32 = arith.constant 0 : i32
    %0 = arith.cmpi eq, %arg1, %c0_i32 : i32
    %1 = arith.extui %0 : i1 to i32
    %c0_i32_0 = arith.constant 0 : i32
    %2 = arith.cmpi ne, %1, %c0_i32_0 : i32
    scf.if %2 {
      %cst_10 = arith.constant 0.000000e+00 : f32
      %12 = vector.broadcast %cst_10 : f32 to vector<128x128xf32>
      %c0_11 = arith.constant 0 : index
      %c0_12 = arith.constant 0 : index
      %13 = vector.load %arg5[%c0_11, %c0_12] : memref<128x128xf32, #tpu.memory_space<vmem>>, vector<128x128xf32>
      tpu.vector_store %arg5[%c0_11, %c0_12], %12 {strides = array<i32>} : memref<128x128xf32, #tpu.memory_space<vmem>>, vector<128x128xf32>,
    } else {
    }
    %c0 = arith.constant 0 : index
    %c0_1 = arith.constant 0 : index
    %3 = vector.load %arg5[%c0, %c0_1] : memref<128x128xf32, #tpu.memory_space<vmem>>, vector<128x128xf32>
    %c0_2 = arith.constant 0 : index
    %c0_3 = arith.constant 0 : index
    %4 = vector.load %arg2[%c0_2, %c0_3] : memref<128x32xbf16, #tpu.memory_space<vmem>>, vector<128x32xbf16>
    %c0_4 = arith.constant 0 : index
    %c0_5 = arith.constant 0 : index
    %5 = vector.load %arg3[%c0_4, %c0_5] : memref<32x128xbf16, #tpu.memory_space<vmem>>, vector<32x128xbf16>
    %cst = arith.constant dense<0.000000e+00> : vector<128x128xf32>
    %6 = tpu.matmul %4, %5, %cst {dimension_numbers = #tpu.dot_dimension_numbers<[1], [0], [0], [1], [0, 0, 1, 1], [], []>} : vector<128x32xbf16>, vector<32x128xbf16>, vector<128x128xf32> -> vector<128x128xf32>
    %7 = arith.addf %3, %6 : vector<128x128xf32>
    %c0_6 = arith.constant 0 : index
    %c0_7 = arith.constant 0 : index
    %8 = vector.load %arg5[%c0_6, %c0_7] : memref<128x128xf32, #tpu.memory_space<vmem>>, vector<128x128xf32>
    tpu.vector_store %arg5[%c0_6, %c0_7], %7 {strides = array<i32>} : memref<128x128xf32, #tpu.memory_space<vmem>>, vector<128x128xf32>,
    %c0_i32_8 = arith.constant 0 : i32
    %9 = arith.cmpi eq, %arg1, %c0_i32_8 : i32
    %10 = arith.extui %9 : i1 to i32
    %c0_i32_9 = arith.constant 0 : i32
    %11 = arith.cmpi ne, %10, %c0_i32_9 : i32
    scf.if %11 {
      %c0_10 = arith.constant 0 : index
      %c0_11 = arith.constant 0 : index
      %12 = vector.load %arg5[%c0_10, %c0_11] : memref<128x128xf32, #tpu.memory_space<vmem>>, vector<128x128xf32>
      %13 = arith.truncf %12 : vector<128x128xf32> to vector<128x128xbf16>
      %c0_12 = arith.constant 0 : index
      %c0_13 = arith.constant 0 : index
      %14 = vector.load %arg4[%c0_12, %c0_13] : memref<128x128xbf16, #tpu.memory_space<vmem>>, vector<128x128xbf16>
      tpu.vector_store %arg4[%c0_12, %c0_13], %13 {strides = array<i32>} : memref<128x128xbf16, #tpu.memory_space<vmem>>, vector<128x128xbf16>,
    } else {
    }
    return
  }
  func.func @transform_0(%arg0: i32, %arg1: i32) -> (i32, i32) {
    %c0_i32 = arith.constant 0 : i32
    return %arg0, %arg1 : i32, i32
  }
  func.func @transform_1(%arg0: i32, %arg1: i32) -> (i32, i32) {
    %c0_i32 = arith.constant 0 : i32
    %c0_i32_0 = arith.constant 0 : i32
    return %arg1, %c0_i32 : i32, i32
  }
  func.func @transform_2(%arg0: i32, %arg1: i32) -> (i32, i32) {
    %c0_i32 = arith.constant 0 : i32
    %c0_i32_0 = arith.constant 0 : i32
    return %arg0, %c0_i32 : i32, i32
  }
}

</mosaic_0001>

<bundles_post_ra>
// kernel: tpu_custom_call.1
= control target key start
LH: loop header
LB: loop body
LE: loop exit
PB: predicated region body
PF: predicated region fallthrough
CT: control target
= control target key end

     0   :  { %7 = vsyncpa [#allocation4], 0  ;;  %s1094_s0 = inlined_call_operand.vmem [shape: bf16[256,32], index: 0, kind: input, shape index: {}]   ;;  %s1095_s1 = inlined_call_operand.vmem [shape: bf16[32,128], index: 1, kind: input, shape index: {}]   ;;  %s1096_s2 = inlined_call_operand.hbm [shape: bf16[256,128], index: 2, kind: output, shape index: {}]  }
   0x1   :  { %9 = vsyncpa [#allocation4 + $0x1], 0  ;;  %s963_s9 = smov 0   ;;  %s965_s10 = smov 0  }
   0x2   :  { %s967_s11 = smov 0   ;;  %s969_s12 = smov 0  }
   0x3   :  { %s971_s13 = smov 0   ;;  %s973_s14 = smov 0  }
   0x4 LB: > { %s654_s15 = sadd.s32 4294967295, %s943_s14   ;;  %s655_s16 = sadd.s32 4294967294, %s943_s14   ;;  %s943_s14 = sphi %s973_s14, %s15_s14   ;;  %s939_s13 = sphi %s971_s13, %s1103_s13   ;;  %s935_s12 = sphi %s969_s12, %s1102_s12   ;;  %s931_s11 = sphi %s967_s11, %s1101_s11   ;;  %s927_s10 = sphi %s965_s10, %s1100_s10   ;;  %s923_s9 = sphi %s963_s9, %s1099_s9  }
   0x5   : > { %s27_s17 = sadd.s32 1, %s939_s13  ;;  %s88_s18 = sadd.s32 1, %s931_s11 }
   0x6   : > { %p29_p0 = scmp.ge.s32.totalorder %s27_s17, 2  ;;  %p98_p1 = scmp.ne.s32.totalorder %s931_s11, %s927_s10 }
   0x7   : > { %p99_p2 = scmp.eq.s32.totalorder %s654_s15, 1  ;;  %p104_p3 = scmp.ne.s32.totalorder %s927_s10, %s923_s9 }
   0x8   : > { %s1105_s17 = smov (%p29_p0, %s27_s17), 0  ;;  %p105_p5 = scmp.eq.s32.totalorder %s655_s16, 1 }
   0x9   : > { %p1003_p4 = por %p99_p2, %p98_p1  ;;  %s85_s20 = ssub.s32 %s939_s13, %s1105_s17 }
   0xa   : > { %p659_p6 = scmp.ge.s32.totalorder %s943_s14, 1  ;;  %p86_p7 = scmp.eq.s32.totalorder %s85_s20, 0 }
   0xb   : > { %p1010_p8 = por %p105_p5, %p104_p3  ;;  %p144_p9 = scmp.lt.s32.totalorder %s943_s14, 3 }
   0xc   : > { %s1016_s22 = scalar_select %p86_p7, %s931_s11, %s88_s18  }
   0xd   : > { %p145_p10 = pnand %p659_p6, %p144_p9 }
   0xe   : > { %s661_s25 = sshll.u32 (!%p145_p10), %s935_s12, 4  ;;  %s171_s4 = sand.u32 (!%p145_p10), 1, %s927_s10  }
   0xf   : > { %148 = sbr.rel (%p145_p10) target bundleno = 252 (0xfc), region = 28  ;;  %p175_p11 = scmp.lt.s32.totalorder (!%p145_p10), %s661_s25, 31 }
  0x10   : > { %s660_s5 = sshll.u32 (!%p145_p10), %s171_s4, 6  ;;  %s718_s7 = sshll.u32 (!%p145_p10), %s935_s12, 10 }
  0x11   : > { %s173_s6 = scalar_lea.vmem (!%p145_p10), [#allocation3], %s660_s5  ;;  %s1043_s18 = scalar_lea.hbm (!%p145_p10), %s1096_s2, %s718_s7 }
  0x12   : > { %s566_s8 = sshll.u32 (!%p145_p10), %s173_s6, 4  ;;  %s1049_s12 = scalar_lea.sflag (!%p145_p10), [#allocation4], %s171_s4  ;;  %s1045_s8 = int_to_ptr.vmem [resolvable:$true] %s566_s8 }
  0x13   : > { %s867_s20 = scalar_lea.vmem (!%p145_p10), %s1045_s8, 1024  ;;  %s945_s23 = smov (!%p145_p10), [#allocation3]  }
  0x14   : > { %v857_v0 = vld [vmem:[%s1095_s1 + $0x8] sm:$0xff]   ;;  %v858_v1 = vld [vmem:[%s1095_s1] sm:$0xff]   ;;  %s1107_s25 = smov (!%p175_p11, %s661_s25), 31  ;;  %vm299_vm0 = vcmask 261120   ;;  %p868_p12 = scmp.ne.s32.totalorder %s1045_s8, %s867_s20 }
  0x15   : > { %776 = vmatprep.subr.bf16.mxu0 %v857_v0  ;;  %796 = vmatprep.subr.bf16.mxu1 %v857_v0  ;;  %s662_s28 = sshll.u32 %s1107_s25, 2  ;;  %s871_s24 = sshll.u32 %s945_s23, 4  ;;  %s872_s24 = int_to_ptr.vmem [resolvable:$false] %s871_s24 }
  0x16   : > { %777 = vmatpush3.bf16.msra.mxu0 %v857_v0  ;;  %798 = vmatpush3.bf16.msra.mxu1 %v857_v0  ;;  %s181_s3 = scalar_lea.vmem %s1094_s0, %s662_s28  ;;  %p869_p13 = pnand %p868_p12, %p1003_p4 }
  0x17   : > { %778 = vmatprep.subr.bf16.mxu0 %v858_v1  ;;  %797 = vmatprep.subr.bf16.mxu1 %v858_v1  ;;  %v859_v2 = vld [vmem:[%s181_s3] sm:$0xff]   ;;  %v861_v4 = vld [vmem:[%s181_s3 + $0x8] sm:$0xff]   ;;  %v863_v6 = vld [vmem:[%s181_s3 + $0x10] sm:$0xff]   ;;  %s873_s25 = scalar_lea.vmem %s872_s24, 2048  ;;  %p874_p1 = scmp.lt.s32.totalorder %s1045_s8, %s872_s24 }
  0x18   : > { %v860_v3 = vld [vmem:[%s181_s3 + $0x20] sm:$0xff]   ;;  %780 = vmatprep.mubr.msk.bf16.mxu0 %vm299_vm0, %v859_v2  ;;  %v862_v5 = vld [vmem:[%s181_s3 + $0x28] sm:$0xff]   ;;  %v864_v7 = vld [vmem:[%s181_s3 + $0x30] sm:$0xff]   ;;  %p870_p0 = pneg %p869_p13  ;;  %p875_p2 = scmp.lt.s32.totalorder %s873_s25, %s867_s20 }
  0x19   : > { %788 = vmatprep.mubr.msk.bf16.mxu1 %vm299_vm0, %v860_v3  ;;  %v865_v8 = vld [vmem:[%s181_s3 + $0x18] sm:$0xff]  }
  0x1a   : > { %779 = vmatpush3.bf16.msra.mxu0 %v858_v1  ;;  %799 = vmatpush3.bf16.msra.mxu1 %v858_v1  ;;  %v866_v9 = vld [vmem:[%s181_s3 + $0x38] sm:$0xff]   ;;  %p876_p3 = por %p875_p2, %p874_p1 }
  0x1c   : > { %p877_p5 = pnand %p876_p3, %p870_p0 }
  0x1d   : > { %781 = vmatmul.mubr.msk.bf16.vlgmr.msra.gmra.mxu0 %vm299_vm0, %v861_v4  ;;  %789 = vmatmul.mubr.msk.bf16.vlgmr.msra.gmra.mxu1 %vm299_vm0, %v862_v5 }
  0x1e   : > { %784 = vmatprep.mubr.msk.bf16.mxu0 %vm299_vm0, %v863_v6  ;;  %792 = vmatprep.mubr.msk.bf16.mxu1 %vm299_vm0, %v864_v7 }
  0x25   : > { %785 = vmatmul.mubr.msk.bf16.gmra.mxu0 %vm299_vm0, %v865_v8  ;;  %793 = vmatmul.mubr.msk.bf16.gmra.mxu1 %vm299_vm0, %v866_v9 }
  0xdd   : > { %v782_v10 = vpop.f32.mrf.mxu0  ;;  %v790_v11 = vpop.f32.mrf.mxu1 }
  0xdf   : > { %v358_v12 = vpop.f32.mrf.mxu0  ;;  %v390_v13 = vpop.f32.mrf.mxu1 }
  0xe1   : > { %v783_v14 = vpop.f32.mrf.mxu0  ;;  %v791_v16 = vpop.f32.mrf.mxu1 }
  0xe2   : > { %v727_v15 = vpack.c.bf16 %v783_v14, %v782_v10  ;;  %v747_v17 = vpack.c.bf16 %v791_v16, %v790_v11 }
  0xe3   : > { %v361_v18 = vpop.f32.mrf.mxu0  ;;  %v393_v20 = vpop.f32.mrf.mxu1 }
  0xe4   : > { %759 = vst [vmem:[%s173_s6 + $0x8] sm:$0xff] %v727_v15   ;;  %v722_v19 = vpack.c.bf16 %v361_v18, %v358_v12  ;;  %763 = vst [vmem:[%s173_s6 + $0x28] sm:$0xff] %v747_v17   ;;  %v742_v21 = vpack.c.bf16 %v393_v20, %v390_v13 }
  0xe5   : > { %v786_v22 = vpop.f32.mrf.mxu0  ;;  %v794_v23 = vpop.f32.mrf.mxu1 }
  0xe6   : > { %723 = vst [vmem:[%s173_s6] sm:$0xff] %v722_v19   ;;  %762 = vst [vmem:[%s173_s6 + $0x20] sm:$0xff] %v742_v21  }
  0xe7   : > { %v374_v24 = vpop.f32.mrf.mxu0  ;;  %v406_v25 = vpop.f32.mrf.mxu1 }
  0xe9   : > { %v787_v26 = vpop.f32.mrf.mxu0  ;;  %v795_v28 = vpop.f32.mrf.mxu1 }
  0xea   : > { %v737_v27 = vpack.c.bf16 %v787_v26, %v786_v22  ;;  %v757_v29 = vpack.c.bf16 %v795_v28, %v794_v23 }
  0xeb   : > { %v377_v30 = vpop.f32.mrf.mxu0  ;;  %v409_v32 = vpop.f32.mrf.mxu1 }
  0xec   : > { %761 = vst [vmem:[%s173_s6 + $0x18] sm:$0xff] %v737_v27   ;;  %v732_v31 = vpack.c.bf16 %v377_v30, %v374_v24  ;;  %765 = vst [vmem:[%s173_s6 + $0x38] sm:$0xff] %v757_v29   ;;  %v752_v33 = vpack.c.bf16 %v409_v32, %v406_v25 }
  0xee   : > { %760 = vst [vmem:[%s173_s6 + $0x10] sm:$0xff] %v732_v31   ;;  %764 = vst [vmem:[%s173_s6 + $0x30] sm:$0xff] %v752_v33  }
  0xef   : > { %880 = shalt.err (!%p877_p5)
}
  0xf0   : > { %s881_s26 = scalar_lea.hbm %s1043_s18, 1024  ;;  %s885_s29 = scalar_lea.hbm %s1096_s2, 2048 }
  0xf1   : > { %p882_p6 = scmp.ne.s32.totalorder %s1043_s18, %s881_s26  ;;  %p886_p10 = scmp.lt.s32.totalorder %s1043_s18, %s1096_s2 }
  0xf2   : > { %p887_p11 = scmp.lt.s32.totalorder %s885_s29, %s881_s26 }
  0xf3   : > { %p883_p7 = pnand %p882_p6, %p1003_p4 }
  0xf4   : > { %p888_p12 = por %p887_p11, %p886_p10 }
  0xf5   : > { %p884_p9 = pneg %p883_p7 }
  0xf7   : > { %p889_p13 = pnand %p888_p12, %p884_p9 }
  0xf9   : > { %892 = shalt.err (!%p889_p13)
}
  0xfa   : > { %s946_s4 = smov 64   ;;  %s947_s5 = smov 4  }
  0xfb   : > { %800 = dma.vmem_to_hbm [thread:$0]  (%p1003_p4), %s1045_s8, 1024, %s1043_s18, %s1049_s12, %s946_s4, %s946_s4, %s947_s5  }
  0xfc PF: > { %p806_p0 = scmp.ge.s32.totalorder %s943_s14, 2  ;;  %s581_s6 = sand.u32 1, %s923_s9  }
  0xfd   : > { %s582_s7 = scalar_lea.sflag [#allocation4], %s581_s6 }
  0xfe   : > { %p803_p1 = pnand %p806_p0, %p1010_p8 }
 0x100   : > { %p804_p2 = pneg %p803_p1 }
 0x102   : > { %918 = dma.done.wait (%p804_p2), %s582_s7, 1024  }
 0x103   : > { %920 = vsyncadd (%p804_p2), %s582_s7, 4294966272  ;;  %s15_s14 = sadd.s32 1, %s943_s14   ;;  %s1099_s9 = smov %s927_s10 }
 0x104   : > { %p12_p3 = scmp.ge.s32.totalorder %s15_s14, 4   ;;  %s1100_s10 = smov %s931_s11 }
 0x105   : > { %s1101_s11 = smov %s1016_s22  ;;  %s1102_s12 = smov %s939_s13 }
 0x106   : > { %s1103_s13 = smov %s1105_s17  ;;  %14 = sbr.rel (!%p12_p3) target bundleno = 4 (0x4), region = 74 }
 0x10b   :  { %587 = vsyncpa [#allocation4], 1 }
 0x10c   :  { %589 = vsyncpa [#allocation4 + $0x1], 1 }

</bundles_post_ra>
